<compile_context>
chip_gen: v6e
topology: v6e:2x2x1
jax: 0.10.0
libtpu: 0.0.40
codegen_flags: <defaults>
</compile_context>

<pallas_src>
import functools

import jax
import jax.numpy as jnp
from jax.experimental import pallas as pl
from jax.experimental.pallas import tpu as pltpu


def _concat_leaky_relu_kernel(x_ref, o_ref, *, c, negative_slope):
    # x_ref: (C, T)   o_ref: (2C, T)   (leading batch dim squeezed by BlockSpec)
    x = x_ref[...]
    # First half of the channel axis: identity copy of x.
    o_ref[:c, :] = x
    # Second half: LeakyReLU(x) with the given negative slope (VPU only).
    o_ref[c:, :] = jnp.where(x >= 0, x, x * jnp.asarray(negative_slope, x.dtype))


def _choose_spatial_tile(hw, max_tile=2048):
    """Largest lane-dense tile (multiple of 128) that evenly divides hw."""
    if hw <= max_tile:
        return hw
    for t in range(max_tile, 127, -128):
        if hw % t == 0:
            return t
    return hw  # fallback: single block along the spatial axis


def concat_leaky_relu(x, negative_slope=0.2):
    """Forward pass of Concatenation: cat([x, leaky_relu(x)], axis=1)."""
    B, C, H, W = x.shape
    hw = H * W
    x2 = x.reshape(B, C, hw)

    tile = _choose_spatial_tile(hw)
    grid = (B, hw // tile)

    itemsize = x.dtype.itemsize
    cost = pl.CostEstimate(
        flops=2 * B * C * hw,          # compare + scale per element
        transcendentals=0,
        bytes_accessed=(B * C * hw + B * 2 * C * hw) * itemsize,
    )

    kernel = functools.partial(
        _concat_leaky_relu_kernel, c=C, negative_slope=negative_slope
    )

    out = pl.pallas_call(
        kernel,
        out_shape=jax.ShapeDtypeStruct((B, 2 * C, hw), x.dtype),
        grid_spec=pltpu.PrefetchScalarGridSpec(
            num_scalar_prefetch=0,
            grid=grid,
            in_specs=[
                pl.BlockSpec((None, C, tile), lambda b, t: (b, 0, t)),
            ],
            out_specs=pl.BlockSpec((None, 2 * C, tile), lambda b, t: (b, 0, t)),
        ),
        compiler_params=pltpu.CompilerParams(
            dimension_semantics=("parallel", "parallel"),
            vmem_limit_bytes=64 * 1024 * 1024,
        ),
        cost_estimate=cost,
    )(x2)

    return out.reshape(B, 2 * C, H, W)


if __name__ == "__main__":
    key = jax.random.PRNGKey(0)
    # Small input consistent with the module's forward: NCHW = (2, 4, 16, 16).
    x = jax.random.normal(key, (2, 4, 16, 16), dtype=jnp.float32)

    out = concat_leaky_relu(x)
    out = jax.block_until_ready(out)

    # Pure-JAX reference of the same forward pass.
    y_ref = jnp.where(x >= 0, x, 0.2 * x)
    ref = jnp.concatenate([x, y_ref], axis=1)

    assert out.shape == (2, 8, 16, 16)
    assert jnp.allclose(out, ref, atol=1e-6, rtol=1e-6)

    print("KERNEL_OK")
</pallas_src>

<mosaic_0001>
module attributes {stable_mosaic.version = 11 : i64} {
  func.func @_concat_leaky_relu_kernel(%arg0: i32, %arg1: i32, %arg2: memref<1x4x256xf32, #tpu.memory_space<vmem>>, %arg3: memref<1x8x256xf32, #tpu.memory_space<vmem>>) attributes {dimension_semantics = [#tpu.dimension_semantics<parallel>, #tpu.dimension_semantics<parallel>], iteration_bounds = array<i64: 2, 1>, scalar_prefetch = 0 : i64, scratch_operands = 0 : i64, tpu.core_type = #tpu.core_type<tc>, window_params = [{transform_indices = @transform_0, window_bounds = array<i64: 1, 4, 256>}, {transform_indices = @transform_1, window_bounds = array<i64: 1, 8, 256>}]} {
    %c0 = arith.constant 0 : index
    %c0_0 = arith.constant 0 : index
    %c0_1 = arith.constant 0 : index
    %0 = vector.load %arg2[%c0, %c0_0, %c0_1] : memref<1x4x256xf32, #tpu.memory_space<vmem>>, vector<1x4x256xf32>
    %1 = vector.shape_cast %0 : vector<1x4x256xf32> to vector<4x256xf32>
    %c0_2 = arith.constant 0 : index
    %c0_3 = arith.constant 0 : index
    %c0_4 = arith.constant 0 : index
    %2 = vector.load %arg3[%c0_2, %c0_3, %c0_4] : memref<1x8x256xf32, #tpu.memory_space<vmem>>, vector<1x4x256xf32>
    %3 = vector.shape_cast %2 : vector<1x4x256xf32> to vector<4x256xf32>
    %4 = vector.shape_cast %1 : vector<4x256xf32> to vector<1x4x256xf32>
    tpu.vector_store %arg3[%c0_2, %c0_3, %c0_4], %4 {strides = array<i32>} : memref<1x8x256xf32, #tpu.memory_space<vmem>>, vector<1x4x256xf32>,
    %cst = arith.constant 0.000000e+00 : f32
    %5 = vector.broadcast %cst : f32 to vector<4x256xf32>
    %6 = arith.cmpf oge, %1, %5 : vector<4x256xf32>
    %cst_5 = arith.constant 2.000000e-01 : f32
    %7 = vector.broadcast %cst_5 : f32 to vector<4x256xf32>
    %8 = arith.mulf %1, %7 : vector<4x256xf32>
    %9 = arith.select %6, %1, %8 : vector<4x256xi1>, vector<4x256xf32>
    %c0_6 = arith.constant 0 : index
    %c4 = arith.constant 4 : index
    %c0_7 = arith.constant 0 : index
    %10 = vector.load %arg3[%c0_6, %c4, %c0_7] : memref<1x8x256xf32, #tpu.memory_space<vmem>>, vector<1x4x256xf32>
    %11 = vector.shape_cast %10 : vector<1x4x256xf32> to vector<4x256xf32>
    %12 = vector.shape_cast %9 : vector<4x256xf32> to vector<1x4x256xf32>
    tpu.vector_store %arg3[%c0_6, %c4, %c0_7], %12 {strides = array<i32>} : memref<1x8x256xf32, #tpu.memory_space<vmem>>, vector<1x4x256xf32>,
    return
  }
  func.func @transform_0(%arg0: i32, %arg1: i32) -> (i32, i32, i32) {
    %c0_i32 = arith.constant 0 : i32
    %c0_i32_0 = arith.constant 0 : i32
    return %arg0, %c0_i32, %arg1 : i32, i32, i32
  }
  func.func @transform_1(%arg0: i32, %arg1: i32) -> (i32, i32, i32) {
    %c0_i32 = arith.constant 0 : i32
    %c0_i32_0 = arith.constant 0 : i32
    return %arg0, %c0_i32, %arg1 : i32, i32, i32
  }
}

</mosaic_0001>

<bundles_post_ra>
// kernel: tpu_custom_call.1
= control target key start
LH: loop header
LB: loop body
LE: loop exit
PB: predicated region body
PF: predicated region fallthrough
CT: control target
= control target key end

     0   :  { %6 = vsyncpa [#allocation3], 0  ;;  %s611_s0 = inlined_call_operand.hbm [shape: f32[2,4,256], index: 0, kind: input, shape index: {}]   ;;  %s612_s1 = inlined_call_operand.hbm [shape: f32[2,8,256], index: 1, kind: output, shape index: {}]  }
   0x1   :  { %8 = vsyncpa [#allocation3 + $0x1], 0 }
   0x2   :  { %9 = vsyncpa [#allocation4], 0 }
   0x3   :  { %11 = vsyncpa [#allocation4 + $0x1], 0  ;;  %s470_s6 = smov 0   ;;  %s472_s7 = smov 0  }
   0x4   :  { %s474_s8 = smov 0   ;;  %s476_s9 = smov 0  }
   0x5   :  { %s478_s10 = smov 0   ;;  %s480_s11 = smov 0  }
   0x6 LB: > { %s268_s12 = sadd.s32 4294967295, %s456_s11   ;;  %s269_s13 = sadd.s32 4294967294, %s456_s11   ;;  %s456_s11 = sphi %s480_s11, %s17_s11   ;;  %s452_s10 = sphi %s478_s10, %s624_s10   ;;  %s448_s9 = sphi %s476_s9, %s623_s9   ;;  %s444_s8 = sphi %s474_s8, %s622_s8   ;;  %s440_s7 = sphi %s472_s7, %s621_s7   ;;  %s436_s6 = sphi %s470_s6, %s620_s6  }
   0x7   : > { %s29_s14 = sadd.s32 1, %s452_s10  ;;  %s38_s15 = sadd.s32 1, %s444_s8 }
   0x8   : > { %p31_p0 = scmp.ge.s32.totalorder %s29_s14, 2  ;;  %p45_p1 = scmp.ne.s32.totalorder %s444_s8, %s440_s7 }
   0x9   : > { %p46_p2 = scmp.eq.s32.totalorder %s456_s11, 0  ;;  %p51_p3 = scmp.ne.s32.totalorder %s440_s7, %s436_s6 }
   0xa   : > { %s626_s14 = smov (%p31_p0, %s29_s14), 0  ;;  %p52_p5 = scmp.eq.s32.totalorder %s268_s12, 0 }
   0xb   : > { %p511_p4 = por %p46_p2, %p45_p1  ;;  %s33_s17 = ssub.s32 %s452_s10, %s626_s14 }
   0xc   : > { %p77_p6 = scmp.eq.s32.totalorder %s268_s12, 1  ;;  %p36_p7 = scmp.eq.s32.totalorder %s33_s17, 0 }
   0xd   : > { %p517_p8 = por %p52_p5, %p51_p3  ;;  %p83_p10 = scmp.eq.s32.totalorder %s269_s13, 1 }
   0xe   : > { %p521_p9 = por %p77_p6, %p45_p1  ;;  %p297_p13 = scmp.lt.s32.totalorder %s456_s11, 2 }
   0xf   : > { %s526_s20 = scalar_select %p36_p7, %s444_s8, %s38_s15  }
  0x10   : > { %p528_p11 = por %p83_p10, %p51_p3  ;;  %s103_s22 = sand.u32 1, %s444_s8  }
  0x11   : > { %s272_s23 = sshll.u32 %s103_s22, 3  ;;  %s283_s24 = sshll.u32 %s452_s10, 7 }
  0x12   : > { %s616_s21 = scalar_select %p528_p11, 1, 0 }
  0x13   : > { %s115_s27 = scalar_lea.hbm %s611_s0, %s283_s24  ;;  %s107_s28 = scalar_lea.vmem [#allocation2], %s272_s23 }
  0x14   : > { %s117_s29 = sshll.u32 %s107_s28, 4  ;;  %p541_p0 = pnand %p297_p13, %p511_p4  ;;  %s118_s29 = int_to_ptr.vmem [resolvable:$true] %s117_s29 }
  0x15   : > { %p275_p1 = scmp.ge.s32.totalorder %s456_s11, 1  ;;  %p122_p2 = scmp.lt.s32.totalorder %s456_s11, 3 }
  0x16   : > { %s104_s2 = scalar_lea.sflag [#allocation3], %s103_s22  ;;  %p350_p3 = pneg %p541_p0 }
  0x17   : > { %s361_s3 = scalar_lea.vmem %s118_s29, 128  ;;  %s458_s4 = smov [#allocation2]  }
  0x18   : > { %p362_p5 = scmp.ne.s32.totalorder %s118_s29, %s361_s3  ;;  %s366_s5 = sshll.u32 %s458_s4, 4  ;;  %s367_s5 = int_to_ptr.vmem [resolvable:$false] %s366_s5 }
  0x19   : > { %s368_s12 = scalar_lea.vmem %s367_s5, 256  ;;  %p369_p10 = scmp.lt.s32.totalorder %s118_s29, %s367_s5 }
  0x1a   : > { %p364_p6 = pnand %p362_p5, %p350_p3  ;;  %p370_p12 = scmp.lt.s32.totalorder %s368_s12, %s361_s3 }
  0x1c   : > { %p365_p7 = pneg %p364_p6  ;;  %p371_p4 = por %p370_p12, %p369_p10 }
  0x1e   : > { %p372_p13 = pnand %p371_p4, %p365_p7 }
  0x20   : > { %375 = shalt.err (!%p372_p13)
}
  0x21   : > { %292 = dma.hbm_to_vmem [thread:$0]  (!%p541_p0), %s115_s27, 128, %s118_s29, %s104_s2  }
  0x22   : > { %p123_p11 = pnand %p275_p1, %p122_p2 }
  0x23   : > { %s556_s13 = sand.u32 (!%p123_p11), 1, %s440_s7  }
  0x24   : > { %126 = sbr.rel (%p123_p11) target bundleno = 66 (0x42), region = 24  ;;  %s276_s15 = sshll.u32 (!%p123_p11), %s556_s13, 3 }
  0x25   : > { %s129_s16 = scalar_lea.sflag (!%p123_p11), [#allocation3], %s556_s13  ;;  %s132_s17 = scalar_lea.vmem (!%p123_p11), [#allocation2], %s276_s15 }
  0x29   : > { %427 = dma.done.wait (%p517_p8), %s129_s16, 128  }
  0x2a   : > { %429 = vsyncadd (%p517_p8), %s129_s16, 4294967168  ;;  %s277_s22 = sshll.u32 %s556_s13, 4  ;;  %v153_v0 = vld [vmem:[%s132_s17] sm:$0xff]  ;;  %s284_s25 = sshll.u32 %s448_s9, 8 }
  0x2b   : > { %s150_s23 = scalar_lea.vmem [#allocation5], %s277_s22  ;;  %v155_v1 = vcombine.high %v153_v0, %v153_v0  ;;  %vm159_vm0 = vcmp.ge.f32.partialorder %v153_v0, 0.0  ;;  %v160_v2 = vmul.f32 0.2, %v153_v0  ;;  %s182_s27 = scalar_lea.hbm %s612_s1, %s284_s25 }
  0x2c   : > { %157 = vst [vmem:[%s150_s23] sm:$0xf] %v153_v0  ;;  %s184_s24 = sshll.u32 %s150_s23, 4  ;;  %s168_s28 = scalar_lea.sflag [#allocation4], %s556_s13  ;;  %s566_s24 = int_to_ptr.vmem [resolvable:$true] %s184_s24 }
  0x2d   : > { %158 = vst [vmem:[%s150_s23 + $0x8] sm:$0xf] %v155_v1  ;;  %v161_v3 = vsel %vm159_vm0, %v153_v0, %v160_v2  ;;  %s376_s29 = scalar_lea.vmem %s566_s24, 256  ;;  %s459_s9 = smov [#allocation5]  }
  0x2e   : > { %v163_v4 = vcombine.low %v161_v3, %v161_v3  ;;  %166 = vst [vmem:[%s150_s23 + $0x8] sm:$0xf0] %v161_v3  ;;  %p377_p8 = scmp.ne.s32.totalorder %s566_s24, %s376_s29  ;;  %s380_s30 = sshll.u32 %s459_s9, 4  ;;  %s381_s30 = int_to_ptr.vmem [resolvable:$false] %s380_s30 }
  0x2f   : > { %s382_s2 = scalar_lea.vmem %s381_s30, 512  ;;  %p383_p0 = scmp.lt.s32.totalorder %s566_s24, %s381_s30 }
  0x30   : > { %165 = vst [vmem:[%s150_s23] sm:$0xf0] %v163_v4  ;;  %p378_p11 = pnand %p377_p8, %p521_p9  ;;  %p384_p1 = scmp.lt.s32.totalorder %s382_s2, %s376_s29 }
  0x32   : > { %p379_p12 = pneg %p378_p11  ;;  %p385_p2 = por %p384_p1, %p383_p0 }
  0x34   : > { %p386_p3 = pnand %p385_p2, %p379_p12 }
  0x36   : > { %389 = shalt.err (!%p386_p3)
}
  0x37   : > { %s390_s3 = scalar_lea.hbm %s182_s27, 256  ;;  %s394_s12 = scalar_lea.hbm %s612_s1, 512 }
  0x38   : > { %p391_p5 = scmp.ne.s32.totalorder %s182_s27, %s390_s3  ;;  %p395_p10 = scmp.lt.s32.totalorder %s182_s27, %s612_s1 }
  0x39   : > { %p396_p4 = scmp.lt.s32.totalorder %s394_s12, %s390_s3 }
  0x3a   : > { %p392_p6 = pnand %p391_p5, %p521_p9 }
  0x3b   : > { %p397_p13 = por %p396_p4, %p395_p10 }
  0x3c   : > { %p393_p7 = pneg %p392_p6 }
  0x3e   : > { %p398_p8 = pnand %p397_p13, %p393_p7 }
  0x40   : > { %401 = shalt.err (!%p398_p8)
}
  0x41   : > { %287 = dma.vmem_to_hbm [thread:$0]  (%p521_p9), %s566_s24, 256, %s182_s27, %s168_s28  }
  0x42 PF: > { %s196_s16 = sand.u32 1, %s436_s6   ;;  %p618_p11 = scmp.ne.s32.totalorder %s616_s21, 0 }
  0x43   : > { %p619_p12 = scmp.ge.s32.totalorder %s456_s11, 2  ;;  %s197_s17 = scalar_lea.sflag [#allocation4], %s196_s16 }
  0x45   : > { %p294_p0 = pnand %p619_p12, %p618_p11 }
  0x47   : > { %p295_p1 = pneg %p294_p0 }
  0x49   : > { %431 = dma.done.wait (%p295_p1), %s197_s17, 256  }
  0x4a   : > { %433 = vsyncadd (%p295_p1), %s197_s17, 4294967040  ;;  %s17_s11 = sadd.s32 1, %s456_s11   ;;  %s620_s6 = smov %s440_s7 }
  0x4b   : > { %p14_p2 = scmp.ge.s32.totalorder %s17_s11, 4   ;;  %s621_s7 = smov %s444_s8 }
  0x4c   : > { %s622_s8 = smov %s526_s20  ;;  %s623_s9 = smov %s452_s10 }
  0x4d   : > { %s624_s10 = smov %s626_s14  ;;  %16 = sbr.rel (!%p14_p2) target bundleno = 6 (0x6), region = 69 }
  0x52   :  { %202 = vsyncpa [#allocation3], 1 }
  0x53   :  { %204 = vsyncpa [#allocation3 + $0x1], 1 }
  0x54   :  { %205 = vsyncpa [#allocation4], 1 }
  0x55   :  { %207 = vsyncpa [#allocation4 + $0x1], 1 }

</bundles_post_ra>
